<compile_context>
chip_gen: v7x
topology: tpu7x:2x2x1
jax: 0.10.0
libtpu: 0.0.40
codegen_flags: <defaults>
</compile_context>

<pallas_src>
import functools

import jax
import jax.numpy as jnp
import numpy as np
from jax.experimental import pallas as pl
from jax.experimental.pallas import tpu as pltpu

HIDDEN = 256


def _round_up(a, m):
    return -(-a // m) * m


def _dqn_kernel(x_ref, w1_ref, b1_ref, w2_ref, b2_ref, wh_ref, bh_ref, out_ref,
                *, bet_col):
    # fc1 + relu  (bf16 operands, f32 accumulate, f32 elementwise)
    x = x_ref[...].astype(jnp.bfloat16)
    h1 = jnp.dot(x, w1_ref[...], preferred_element_type=jnp.float32) + b1_ref[...]
    h1 = jnp.maximum(h1, 0.0)

    # fc2 + relu
    h2 = jnp.dot(h1.astype(jnp.bfloat16), w2_ref[...],
                 preferred_element_type=jnp.float32) + b2_ref[...]
    h2 = jnp.maximum(h2, 0.0)

    # Fused, lane-dense head: [actions | bet | zero-pad] in one matmul.
    # Sigmoid is applied only to the true bet column (index == bet_col).
    head = jnp.dot(h2.astype(jnp.bfloat16), wh_ref[...],
                   preferred_element_type=jnp.float32) + bh_ref[...]
    col = jax.lax.broadcasted_iota(jnp.int32, head.shape, dimension=1)
    is_bet = col == bet_col
    out_ref[...] = jnp.where(is_bet, jax.nn.sigmoid(head), head).astype(out_ref.dtype)


def dqn_forward(x, params, *, action_size, tile_b=1024):
    """x: [B, state_size] (f32 or bf16). Returns [B, action_size + 1] float32."""
    w1, b1, w2, b2, wh, bh = params
    B, state_size = x.shape
    head_pad = wh.shape[1]          # lane-dense padded head width (multiple of 128)
    head_out = action_size + 1

    # Pad batch up to a sublane-friendly tile multiple.
    b_pad = max(8, _round_up(B, 8))
    tb = min(tile_b, b_pad)
    # v7x: make sure the "parallel" batch axis has >= 2 grid steps when it can
    # be split on 8-row boundaries, so both TensorCores get work.
    if b_pad // tb < 2 and b_pad >= 16:
        tb = _round_up(b_pad // 2, 8)
    b_pad = _round_up(b_pad, tb)
    if b_pad != B:
        x = jnp.pad(x, ((0, b_pad - B), (0, 0)))

    const2 = lambda i: (0, 0)  # weights/biases: same block every step -> VMEM resident
    kernel = functools.partial(_dqn_kernel, bet_col=action_size)

    out = pl.pallas_call(
        kernel,
        out_shape=jax.ShapeDtypeStruct((b_pad, head_pad), jnp.float32),
        grid=(b_pad // tb,),
        in_specs=[
            pl.BlockSpec((tb, state_size), lambda i: (i, 0)),   # x tile
            pl.BlockSpec(w1.shape, const2),
            pl.BlockSpec(b1.shape, const2),
            pl.BlockSpec(w2.shape, const2),
            pl.BlockSpec(b2.shape, const2),
            pl.BlockSpec(wh.shape, const2),
            pl.BlockSpec(bh.shape, const2),
        ],
        out_specs=pl.BlockSpec((tb, head_pad), lambda i: (i, 0)),
        compiler_params=pltpu.CompilerParams(
            dimension_semantics=("parallel",),  # v7x: batch tiles across both TCs
        ),
    )(x, w1, b1, w2, b2, wh, bh)

    return out[:B, :head_out]


def init_params(key, state_size, action_size, hidden=HIDDEN):
    """PyTorch-style uniform(-1/sqrt(fan_in), 1/sqrt(fan_in)) init.

    Weights are stored [in, out] in bf16; biases [1, out] in f32.
    fc3 and fc_bet are fused into one head, then zero-padded to a lane-dense
    width (multiple of 128): wh = [w3 | wb | 0], bh = [b3 | bb | 0].
    """
    def linear(key, fan_in, fan_out):
        kw, kb = jax.random.split(key)
        bound = 1.0 / np.sqrt(fan_in)
        w = jax.random.uniform(kw, (fan_in, fan_out), jnp.float32, -bound, bound)
        b = jax.random.uniform(kb, (1, fan_out), jnp.float32, -bound, bound)
        return w, b

    k1, k2, k3, k4 = jax.random.split(key, 4)
    w1, b1 = linear(k1, state_size, hidden)
    w2, b2 = linear(k2, hidden, hidden)
    w3, b3 = linear(k3, hidden, action_size)
    wb, bb = linear(k4, hidden, 1)

    head_out = action_size + 1
    head_pad = max(128, _round_up(head_out, 128))
    wh = jnp.concatenate([w3, wb], axis=1)               # [hidden, action_size + 1]
    bh = jnp.concatenate([b3, bb], axis=1)               # [1, action_size + 1]
    wh = jnp.pad(wh, ((0, 0), (0, head_pad - head_out))) # -> [hidden, head_pad]
    bh = jnp.pad(bh, ((0, 0), (0, head_pad - head_out))) # -> [1, head_pad]

    to_bf16 = lambda a: a.astype(jnp.bfloat16)
    return (to_bf16(w1), b1, to_bf16(w2), b2, to_bf16(wh), bh)


def dqn_reference(x, params, *, action_size):
    """Plain-JAX reference using the same bf16-weight / f32-accumulate scheme."""
    w1, b1, w2, b2, wh, bh = params
    h = jnp.maximum(jnp.dot(x.astype(jnp.bfloat16), w1,
                            preferred_element_type=jnp.float32) + b1, 0.0)
    h = jnp.maximum(jnp.dot(h.astype(jnp.bfloat16), w2,
                            preferred_element_type=jnp.float32) + b2, 0.0)
    head = jnp.dot(h.astype(jnp.bfloat16), wh,
                   preferred_element_type=jnp.float32) + bh
    actions = head[:, :action_size]
    bet = jax.nn.sigmoid(head[:, action_size:action_size + 1])
    return jnp.concatenate([actions, bet], axis=-1)


if __name__ == "__main__":
    batch = 2
    state_size = 32
    action_size = 4

    key = jax.random.PRNGKey(0)
    k_params, k_x = jax.random.split(key)
    params = init_params(k_params, state_size, action_size)
    x = jax.random.normal(k_x, (batch, state_size), jnp.float32)

    out = jax.block_until_ready(dqn_forward(x, params, action_size=action_size))
    ref = jax.block_until_ready(dqn_reference(x, params, action_size=action_size))

    assert out.shape == (batch, action_size + 1), out.shape
    np.testing.assert_allclose(np.asarray(out), np.asarray(ref), rtol=1e-2, atol=1e-2)
    print("KERNEL_OK")
</pallas_src>

<mosaic_0001>
module attributes {stable_mosaic.version = 11 : i64} {
  func.func @_dqn_kernel(%arg0: i32, %arg1: memref<8x32xf32, #tpu.memory_space<vmem>>, %arg2: memref<32x256xbf16, #tpu.memory_space<vmem>>, %arg3: memref<1x256xf32, #tpu.memory_space<vmem>>, %arg4: memref<256x256xbf16, #tpu.memory_space<vmem>>, %arg5: memref<1x256xf32, #tpu.memory_space<vmem>>, %arg6: memref<256x128xbf16, #tpu.memory_space<vmem>>, %arg7: memref<1x128xf32, #tpu.memory_space<vmem>>, %arg8: memref<8x128xf32, #tpu.memory_space<vmem>>) attributes {dimension_semantics = [#tpu.dimension_semantics<parallel>], iteration_bounds = array<i64: 1>, scalar_prefetch = 0 : i64, scratch_operands = 0 : i64, tpu.core_type = #tpu.core_type<tc>, window_params = [{transform_indices = @transform_0, window_bounds = array<i64: 8, 32>}, {pipeline_mode = #tpu.pipeline_mode<synchronous>, transform_indices = @transform_1, window_bounds = array<i64: 32, 256>}, {pipeline_mode = #tpu.pipeline_mode<synchronous>, transform_indices = @transform_2, window_bounds = array<i64: 1, 256>}, {pipeline_mode = #tpu.pipeline_mode<synchronous>, transform_indices = @transform_3, window_bounds = array<i64: 256, 256>}, {pipeline_mode = #tpu.pipeline_mode<synchronous>, transform_indices = @transform_4, window_bounds = array<i64: 1, 256>}, {pipeline_mode = #tpu.pipeline_mode<synchronous>, transform_indices = @transform_5, window_bounds = array<i64: 256, 128>}, {pipeline_mode = #tpu.pipeline_mode<synchronous>, transform_indices = @transform_6, window_bounds = array<i64: 1, 128>}, {transform_indices = @transform_7, window_bounds = array<i64: 8, 128>}]} {
    %c0 = arith.constant 0 : index
    %c0_0 = arith.constant 0 : index
    %0 = vector.load %arg1[%c0, %c0_0] : memref<8x32xf32, #tpu.memory_space<vmem>>, vector<8x32xf32>
    %1 = arith.truncf %0 : vector<8x32xf32> to vector<8x32xbf16>
    %c0_1 = arith.constant 0 : index
    %c0_2 = arith.constant 0 : index
    %2 = vector.load %arg2[%c0_1, %c0_2] : memref<32x256xbf16, #tpu.memory_space<vmem>>, vector<32x256xbf16>
    %cst = arith.constant dense<0.000000e+00> : vector<8x256xf32>
    %3 = tpu.matmul %1, %2, %cst {dimension_numbers = #tpu.dot_dimension_numbers<[1], [0], [0], [1], [0, 0, 1, 1], [], []>} : vector<8x32xbf16>, vector<32x256xbf16>, vector<8x256xf32> -> vector<8x256xf32>
    %c0_3 = arith.constant 0 : index
    %c0_4 = arith.constant 0 : index
    %4 = vector.load %arg3[%c0_3, %c0_4] : memref<1x256xf32, #tpu.memory_space<vmem>>, vector<1x256xf32>
    %5 = vector.broadcast %4 : vector<1x256xf32> to vector<8x256xf32>
    %6 = arith.addf %3, %5 : vector<8x256xf32>
    %cst_5 = arith.constant 0.000000e+00 : f32
    %7 = vector.broadcast %cst_5 : f32 to vector<8x256xf32>
    %8 = arith.maximumf %6, %7 : vector<8x256xf32>
    %9 = arith.truncf %8 : vector<8x256xf32> to vector<8x256xbf16>
    %c0_6 = arith.constant 0 : index
    %c0_7 = arith.constant 0 : index
    %10 = vector.load %arg4[%c0_6, %c0_7] : memref<256x256xbf16, #tpu.memory_space<vmem>>, vector<256x256xbf16>
    %cst_8 = arith.constant dense<0.000000e+00> : vector<8x256xf32>
    %11 = tpu.matmul %9, %10, %cst_8 {dimension_numbers = #tpu.dot_dimension_numbers<[1], [0], [0], [1], [0, 0, 1, 1], [], []>} : vector<8x256xbf16>, vector<256x256xbf16>, vector<8x256xf32> -> vector<8x256xf32>
    %c0_9 = arith.constant 0 : index
    %c0_10 = arith.constant 0 : index
    %12 = vector.load %arg5[%c0_9, %c0_10] : memref<1x256xf32, #tpu.memory_space<vmem>>, vector<1x256xf32>
    %13 = vector.broadcast %12 : vector<1x256xf32> to vector<8x256xf32>
    %14 = arith.addf %11, %13 : vector<8x256xf32>
    %cst_11 = arith.constant 0.000000e+00 : f32
    %15 = vector.broadcast %cst_11 : f32 to vector<8x256xf32>
    %16 = arith.maximumf %14, %15 : vector<8x256xf32>
    %17 = arith.truncf %16 : vector<8x256xf32> to vector<8x256xbf16>
    %c0_12 = arith.constant 0 : index
    %c0_13 = arith.constant 0 : index
    %18 = vector.load %arg6[%c0_12, %c0_13] : memref<256x128xbf16, #tpu.memory_space<vmem>>, vector<256x128xbf16>
    %cst_14 = arith.constant dense<0.000000e+00> : vector<8x128xf32>
    %19 = tpu.matmul %17, %18, %cst_14 {dimension_numbers = #tpu.dot_dimension_numbers<[1], [0], [0], [1], [0, 0, 1, 1], [], []>} : vector<8x256xbf16>, vector<256x128xbf16>, vector<8x128xf32> -> vector<8x128xf32>
    %c0_15 = arith.constant 0 : index
    %c0_16 = arith.constant 0 : index
    %20 = vector.load %arg7[%c0_15, %c0_16] : memref<1x128xf32, #tpu.memory_space<vmem>>, vector<1x128xf32>
    %21 = vector.broadcast %20 : vector<1x128xf32> to vector<8x128xf32>
    %22 = arith.addf %19, %21 : vector<8x128xf32>
    %23 = tpu.iota {dimensions = array<i32: 1>} : vector<8x128xi32>
    %c4_i32 = arith.constant 4 : i32
    %24 = vector.broadcast %c4_i32 : i32 to vector<8x128xi32>
    %25 = arith.cmpi eq, %23, %24 : vector<8x128xi32>
    %26 = arith.negf %22 : vector<8x128xf32>
    %27 = math.exp %26 : vector<8x128xf32>
    %cst_17 = arith.constant 1.000000e+00 : f32
    %28 = vector.broadcast %cst_17 : f32 to vector<8x128xf32>
    %29 = arith.addf %28, %27 : vector<8x128xf32>
    %30 = arith.divf %28, %29 : vector<8x128xf32>
    %31 = arith.select %25, %30, %22 : vector<8x128xi1>, vector<8x128xf32>
    %c0_18 = arith.constant 0 : index
    %c0_19 = arith.constant 0 : index
    %32 = vector.load %arg8[%c0_18, %c0_19] : memref<8x128xf32, #tpu.memory_space<vmem>>, vector<8x128xf32>
    tpu.vector_store %arg8[%c0_18, %c0_19], %31 {strides = array<i32>} : memref<8x128xf32, #tpu.memory_space<vmem>>, vector<8x128xf32>,
    return
  }
  func.func @transform_0(%arg0: i32) -> (i32, i32) {
    %c0_i32 = arith.constant 0 : i32
    %c0_i32_0 = arith.constant 0 : i32
    return %arg0, %c0_i32 : i32, i32
  }
  func.func @transform_1(%arg0: i32) -> (i32, i32) {
    %c0_i32 = arith.constant 0 : i32
    %c0_i32_0 = arith.constant 0 : i32
    %c0_i32_1 = arith.constant 0 : i32
    return %c0_i32, %c0_i32_0 : i32, i32
  }
  func.func @transform_2(%arg0: i32) -> (i32, i32) {
    %c0_i32 = arith.constant 0 : i32
    %c0_i32_0 = arith.constant 0 : i32
    %c0_i32_1 = arith.constant 0 : i32
    return %c0_i32, %c0_i32_0 : i32, i32
  }
  func.func @transform_3(%arg0: i32) -> (i32, i32) {
    %c0_i32 = arith.constant 0 : i32
    %c0_i32_0 = arith.constant 0 : i32
    %c0_i32_1 = arith.constant 0 : i32
    return %c0_i32, %c0_i32_0 : i32, i32
  }
  func.func @transform_4(%arg0: i32) -> (i32, i32) {
    %c0_i32 = arith.constant 0 : i32
    %c0_i32_0 = arith.constant 0 : i32
    %c0_i32_1 = arith.constant 0 : i32
    return %c0_i32, %c0_i32_0 : i32, i32
  }
  func.func @transform_5(%arg0: i32) -> (i32, i32) {
    %c0_i32 = arith.constant 0 : i32
    %c0_i32_0 = arith.constant 0 : i32
    %c0_i32_1 = arith.constant 0 : i32
    return %c0_i32, %c0_i32_0 : i32, i32
  }
  func.func @transform_6(%arg0: i32) -> (i32, i32) {
    %c0_i32 = arith.constant 0 : i32
    %c0_i32_0 = arith.constant 0 : i32
    %c0_i32_1 = arith.constant 0 : i32
    return %c0_i32, %c0_i32_0 : i32, i32
  }
  func.func @transform_7(%arg0: i32) -> (i32, i32) {
    %c0_i32 = arith.constant 0 : i32
    %c0_i32_0 = arith.constant 0 : i32
    return %arg0, %c0_i32 : i32, i32
  }
}

</mosaic_0001>

<bundles_post_ra>
// kernel: tpu_custom_call.1
= control target key start
LH: loop header
LB: loop body
LE: loop exit
PB: predicated region body
PF: predicated region fallthrough
CT: control target
= control target key end

     0   :  { %12 = vsyncpa [#allocation3], 0  ;;  %s1024_s0 = inlined_call_operand.hbm [shape: f32[8,32], index: 0, kind: input, shape index: {}]   ;;  %s1025_s1 = inlined_call_operand.hbm [shape: bf16[32,256], index: 1, kind: input, shape index: {}]   ;;  %s1026_s2 = inlined_call_operand.vmem [shape: f32[1,256], index: 2, kind: input, shape index: {}]   ;;  %s1027_s3 = inlined_call_operand.hbm [shape: bf16[256,256], index: 3, kind: input, shape index: {}]   ;;  %s1028_s4 = inlined_call_operand.vmem [shape: f32[1,256], index: 4, kind: input, shape index: {}]   ;;  %s1029_s5 = inlined_call_operand.hbm [shape: bf16[256,128], index: 5, kind: input, shape index: {}]   ;;  %s1030_s6 = inlined_call_operand.vmem [shape: f32[1,128], index: 6, kind: input, shape index: {}]   ;;  %s1031_s7 = inlined_call_operand.hbm [shape: f32[8,128], index: 7, kind: output, shape index: {}]  }
   0x1   :  { %13 = vsyncpa [#allocation6], 0 }
   0x2   :  { %14 = vsyncpa [#allocation9], 0 }
   0x3   :  { %15 = vsyncpa [#allocation4], 0  ;;  %s899_s24 = smov [#allocation5]   ;;  %s781_s28 = scalar_lea.hbm %s1025_s1, 512 }
   0x4   :  { %s31_s25 = sshll.u32 %s899_s24, 4  ;;  %p782_p0 = scmp.ne.s32.totalorder %s1025_s1, %s781_s28  ;;  %s32_s25 = int_to_ptr.vmem [resolvable:$true] %s31_s25 }
   0x5   :  { %p785_p1 = scmp.lt.u32.totalorder %s781_s28, %s1025_s1 }
   0x7   :  { %p787_p2 = pnand %p785_p1, %p782_p0 }
   0x9   :  { %790 = shalt.err (!%p787_p2)
}
   0xa   :  { %s791_s10 = scalar_lea.vmem %s32_s25, 512  ;;  %p796_p4 = scmp.lt.s32.totalorder %s32_s25, %s32_s25 }
   0xb   :  { %p792_p3 = scmp.ne.s32.totalorder %s32_s25, %s791_s10  ;;  %p797_p5 = scmp.lt.s32.totalorder %s791_s10, %s791_s10 }
   0xd   :  { %p798_p6 = por %p797_p5, %p796_p4 }
   0xf   :  { %p799_p7 = pnand %p798_p6, %p792_p3 }
  0x11   :  { %802 = shalt.err (!%p799_p7)
}
  0x12   :  { %s900_s11 = smov 128   ;;  %s901_s12 = smov 8  }
  0x13   :  { %37 = dma.hbm_to_vmem [thread:$0]  %s1025_s1, 512, %s32_s25, [#allocation6], %s900_s11, %s900_s11, %s901_s12  }
  0x14   :  { %s902_s15 = smov [#allocation2]   ;;  %s903_s17 = smov [#allocation7]  }
  0x15   :  { %s22_s16 = sshll.u32 %s902_s15, 4  ;;  %s45_s18 = sshll.u32 %s903_s17, 4  ;;  %s23_s16 = int_to_ptr.vmem [resolvable:$true] %s22_s16  ;;  %s46_s18 = int_to_ptr.vmem [resolvable:$true] %s45_s18 }
  0x16   :  { %s803_s21 = scalar_lea.hbm %s1024_s0, 128 }
  0x17   :  { %p804_p8 = scmp.ne.s32.totalorder %s1024_s0, %s803_s21  ;;  %p807_p9 = scmp.lt.u32.totalorder %s803_s21, %s1024_s0 }
  0x19   :  { %p809_p10 = pnand %p807_p9, %p804_p8 }
  0x1b   :  { %812 = shalt.err (!%p809_p10)
}
  0x1c   :  { %s813_s1 = scalar_lea.vmem %s23_s16, 128  ;;  %p818_p12 = scmp.lt.s32.totalorder %s23_s16, %s23_s16 }
  0x1d   :  { %p814_p11 = scmp.ne.s32.totalorder %s23_s16, %s813_s1  ;;  %p819_p13 = scmp.lt.s32.totalorder %s813_s1, %s813_s1 }
  0x1f   :  { %p820_p0 = por %p819_p13, %p818_p12 }
  0x21   :  { %p821_p1 = pnand %p820_p0, %p814_p11 }
  0x23   :  { %824 = shalt.err (!%p821_p1)
}
  0x24   :  { %25 = dma.hbm_to_vmem [thread:$0]  %s1024_s0, 128, %s23_s16, [#allocation3]  }
  0x25   :  { %s825_s30 = scalar_lea.hbm %s1027_s3, 4096 }
  0x26   :  { %p826_p2 = scmp.ne.s32.totalorder %s1027_s3, %s825_s30  ;;  %p829_p3 = scmp.lt.u32.totalorder %s825_s30, %s1027_s3 }
  0x28   :  { %p831_p4 = pnand %p829_p3, %p826_p2 }
  0x2a   :  { %834 = shalt.err (!%p831_p4)
}
  0x2b   :  { %s835_s14 = scalar_lea.vmem %s46_s18, 4096  ;;  %p840_p6 = scmp.lt.s32.totalorder %s46_s18, %s46_s18 }
  0x2c   :  { %p836_p5 = scmp.ne.s32.totalorder %s46_s18, %s835_s14  ;;  %p841_p7 = scmp.lt.s32.totalorder %s835_s14, %s835_s14 }
  0x2e   :  { %p842_p8 = por %p841_p7, %p840_p6 }
  0x30   :  { %p843_p9 = pnand %p842_p8, %p836_p5 }
  0x32   :  { %846 = shalt.err (!%p843_p9)
}
  0x33   :  { %51 = dma.hbm_to_vmem [thread:$0]  %s1027_s3, 4096, %s46_s18, [#allocation6], %s900_s11, %s900_s11, %s901_s12  }
  0x34   :  { %s904_s16 = smov [#allocation8]   ;;  %s847_s21 = scalar_lea.hbm %s1029_s5, 2048 }
  0x35   :  { %s59_s17 = sshll.u32 %s904_s16, 4  ;;  %p848_p10 = scmp.ne.s32.totalorder %s1029_s5, %s847_s21  ;;  %s60_s17 = int_to_ptr.vmem [resolvable:$true] %s59_s17 }
  0x36   :  { %p851_p11 = scmp.lt.u32.totalorder %s847_s21, %s1029_s5 }
  0x38   :  { %p853_p12 = pnand %p851_p11, %p848_p10 }
  0x3a   :  { %856 = shalt.err (!%p853_p12)
}
  0x3b   :  { %s857_s1 = scalar_lea.vmem %s60_s17, 2048  ;;  %p862_p0 = scmp.lt.s32.totalorder %s60_s17, %s60_s17 }
  0x3c   :  { %p858_p13 = scmp.ne.s32.totalorder %s60_s17, %s857_s1  ;;  %p863_p1 = scmp.lt.s32.totalorder %s857_s1, %s857_s1 }
  0x3e   :  { %p864_p2 = por %p863_p1, %p862_p0 }
  0x40   :  { %p865_p3 = pnand %p864_p2, %p858_p13 }
  0x42   :  { %868 = shalt.err (!%p865_p3)
}
  0x43   :  { %s905_s3 = smov 64   ;;  %s906_s11 = smov 4  }
  0x44   :  { %65 = dma.hbm_to_vmem [thread:$0]  %s1029_s5, 2048, %s60_s17, [#allocation9], %s905_s3, %s905_s3, %s906_s11  }
  0x45   :  { %891 = dma.done.wait [#allocation3], 128  }
  0x46   :  { %892 = vsyncadd [#allocation3], 4294967168 }
  0x47   :  { %893 = dma.done.wait [#allocation6], 4608  }
  0x48   :  { %894 = vsyncadd [#allocation6], 4294962688 }
  0x49   :  { %895 = dma.done.wait [#allocation9], 2048  }
  0x4a   :  { %896 = vsyncadd [#allocation9], 4294965248  ;;  %v907_v0 = vmov 0   ;;  %v707_v1 = vld [vmem:[#allocation5 + $0x4] ss:$8 sps:$4 sm:$0xff]   ;;  %v81_v5 = vld [vmem:[#allocation2] sm:$0xff]  ;;  %v89_v51 = vlaneseq }
  0x4b   :  { %155 = vmatprep.mubr.bf16.mxu0 %v907_v0  ;;  %v709_v2 = vld [vmem:[#allocation5] ss:$8 sps:$4 sm:$0xff]   ;;  %123 = vmatprep.subr.bf16.mxu0 %v707_v1  ;;  %v710_v3 = vld [vmem:[#allocation5 + $0x14] ss:$8 sps:$4 sm:$0xff]   ;;  %v712_v4 = vld [vmem:[#allocation5 + $0x10] ss:$8 sps:$4 sm:$0xff]   ;;  %v82_v9 = vpack.c.bf16 %v81_v5, %v81_v5 }
  0x4c   :  { %124 = vmatpush1.bf16.msra.mxu0 %v709_v2  ;;  %v713_v6 = vld [vmem:[#allocation7 + $0x4] ss:$8 sps:$4 sm:$0xff]   ;;  %v715_v7 = vld [vmem:[#allocation7] ss:$8 sps:$4 sm:$0xff]   ;;  %v716_v8 = vld [vmem:[#allocation7 + $0x14] ss:$8 sps:$4 sm:$0xff]  }
  0x4d   :  { %125 = vmatprep.subr.bf16.mxu0 %v710_v3  ;;  %372 = vmatprep.subr.bf16.mxu1 %v713_v6  ;;  %v718_v10 = vld [vmem:[#allocation7 + $0x10] ss:$8 sps:$4 sm:$0xff]   ;;  %vm119_vm0 = vcmask 261120   ;;  %v719_v11 = vld [vmem:[#allocation7 + $0x24] ss:$8 sps:$4 sm:$0xff]   ;;  %v90_v52 = vshrl.u32 %v89_v51, 7 }
  0x4e   :  { %373 = vmatpush1.bf16.msra.mxu1 %v715_v7  ;;  %v721_v12 = vld [vmem:[#allocation7 + $0x20] ss:$8 sps:$4 sm:$0xff]   ;;  %v722_v13 = vld [vmem:[#allocation7 + $0x34] ss:$8 sps:$4 sm:$0xff]   ;;  %v724_v14 = vld [vmem:[#allocation7 + $0x30] ss:$8 sps:$4 sm:$0xff]  }
  0x4f   :  { %374 = vmatprep.subr.bf16.mxu1 %v716_v8  ;;  %v725_v15 = vld [vmem:[#allocation7 + $0x44] ss:$8 sps:$4 sm:$0xff]   ;;  %v727_v16 = vld [vmem:[#allocation7 + $0x40] ss:$8 sps:$4 sm:$0xff]   ;;  %v728_v17 = vld [vmem:[#allocation7 + $0x54] ss:$8 sps:$4 sm:$0xff]  }
  0x50   :  { %126 = vmatpush1.bf16.msra.mxu0 %v712_v4  ;;  %v730_v18 = vld [vmem:[#allocation7 + $0x50] ss:$8 sps:$4 sm:$0xff]   ;;  %v731_v19 = vld [vmem:[#allocation7 + $0x64] ss:$8 sps:$4 sm:$0xff]   ;;  %v733_v20 = vld [vmem:[#allocation7 + $0x60] ss:$8 sps:$4 sm:$0xff]  }
  0x51   :  { %v734_v21 = vld [vmem:[#allocation7 + $0x74] ss:$8 sps:$4 sm:$0xff]   ;;  %v736_v22 = vld [vmem:[#allocation7 + $0x70] ss:$8 sps:$4 sm:$0xff]   ;;  %v737_v23 = vld [vmem:[#allocation7 + $0x84] ss:$8 sps:$4 sm:$0xff]  }
  0x52   :  { %375 = vmatpush1.bf16.msra.mxu1 %v718_v10  ;;  %v739_v24 = vld [vmem:[#allocation7 + $0x80] ss:$8 sps:$4 sm:$0xff]   ;;  %v740_v25 = vld [vmem:[#allocation7 + $0x94] ss:$8 sps:$4 sm:$0xff]   ;;  %v742_v26 = vld [vmem:[#allocation7 + $0x90] ss:$8 sps:$4 sm:$0xff]  }
  0x53   :  { %624 = vmatmul.mubr.msk.bf16.vlgmr.msra.gmra.mrb[0].mxu0 %vm119_vm0, %v82_v9  ;;  %376 = vmatprep.subr.bf16.mxu1 %v719_v11  ;;  %v743_v27 = vld [vmem:[#allocation7 + $0xa4] ss:$8 sps:$4 sm:$0xff]   ;;  %v745_v28 = vld [vmem:[#allocation7 + $0xa0] ss:$8 sps:$4 sm:$0xff]   ;;  %v746_v29 = vld [vmem:[#allocation7 + $0xb4] ss:$8 sps:$4 sm:$0xff]  }
  0x54   :  { %v748_v30 = vld [vmem:[#allocation7 + $0xb0] ss:$8 sps:$4 sm:$0xff]   ;;  %v749_v31 = vld [vmem:[#allocation7 + $0xc4] ss:$8 sps:$4 sm:$0xff]   ;;  %v751_v32 = vld [vmem:[#allocation7 + $0xc0] ss:$8 sps:$4 sm:$0xff]  }
  0x55   :  { %v752_v33 = vld [vmem:[#allocation7 + $0xd4] ss:$8 sps:$4 sm:$0xff]   ;;  %v754_v34 = vld [vmem:[#allocation7 + $0xd0] ss:$8 sps:$4 sm:$0xff]   ;;  %v755_v35 = vld [vmem:[#allocation7 + $0xe4] ss:$8 sps:$4 sm:$0xff]  }
  0x56   :  { %377 = vmatpush1.bf16.msra.mxu1 %v721_v12  ;;  %v757_v36 = vld [vmem:[#allocation7 + $0xe0] ss:$8 sps:$4 sm:$0xff]   ;;  %v758_v37 = vld [vmem:[#allocation7 + $0xf4] ss:$8 sps:$4 sm:$0xff]   ;;  %v760_v38 = vld [vmem:[#allocation7 + $0xf0] ss:$8 sps:$4 sm:$0xff]  }
  0x57   :  { %378 = vmatprep.subr.bf16.mxu1 %v722_v13  ;;  %v761_v39 = vld [vmem:[#allocation8 + $0x40] sm:$0xff]   ;;  %v763_v41 = vld [vmem:[#allocation8 + $0x48] sm:$0xff]   ;;  %v765_v43 = vld [vmem:[#allocation8 + $0x50] sm:$0xff]   ;;  %v91_v53 = vsub.s32 0, %v90_v52  ;;  %v95_v55 = vsub.s32 1, %v90_v52 }
  0x58   :  { %v762_v40 = vld [vmem:[#allocation8] sm:$0xff]   ;;  %675 = vmatprep.subr.bf16.mxu0 %v761_v39  ;;  %v764_v42 = vld [vmem:[#allocation8 + $0x8] sm:$0xff]   ;;  %v766_v44 = vld [vmem:[#allocation8 + $0x10] sm:$0xff]  }
  0x59   :  { %676 = vmatpush3.bf16.msra.mxu0 %v762_v40  ;;  %v767_v45 = vld [vmem:[#allocation8 + $0x58] sm:$0xff]   ;;  %v769_v47 = vld [vmem:[#allocation8 + $0x60] sm:$0xff]   ;;  %v771_v49 = vld [vmem:[#allocation8 + $0x68] sm:$0xff]  }
  0x5a   :  { %379 = vmatpush1.bf16.msra.mxu1 %v724_v14  ;;  %677 = vmatprep.subr.bf16.mxu0 %v763_v41  ;;  %v768_v46 = vld [vmem:[#allocation8 + $0x18] sm:$0xff]   ;;  %v770_v48 = vld [vmem:[#allocation8 + $0x20] sm:$0xff]   ;;  %v772_v50 = vld [vmem:[#allocation8 + $0x28] sm:$0xff]  }
  0x5b   :  { %380 = vmatprep.subr.bf16.mxu1 %v725_v15  ;;  %v87_v54 = vld [vmem:[%s1026_s2] sm:$0x3]  ;;  %v773_v4 = vld [vmem:[#allocation8 + $0x70] sm:$0xff]  }
  0x5c   :  { %v92_v56 = vrot.slane %v87_v54, %v91_v53  ;;  %v96_v57 = vrot.slane %v87_v54, %v95_v55  ;;  %v774_v5 = vld [vmem:[#allocation8 + $0x30] sm:$0xff]   ;;  %v775_v6 = vld [vmem:[#allocation8 + $0x78] sm:$0xff]  }
  0x5d   :  { %678 = vmatpush3.bf16.msra.mxu0 %v764_v42  ;;  %v776_v7 = vld [vmem:[#allocation8 + $0x38] sm:$0xff]  }
  0x5e   :  { %381 = vmatpush1.bf16.msra.mxu1 %v727_v16  ;;  %679 = vmatprep.subr.bf16.mxu0 %v765_v43  ;;  %v200_v8 = vld [vmem:[%s1028_s4] sm:$0x3]  ;;  %s908_s4 = smov [#allocation10]  }
  0x5f   :  { %382 = vmatprep.subr.bf16.mxu1 %v728_v17  ;;  %v205_v9 = vrot.slane %v200_v8, %v91_v53  ;;  %v209_v10 = vrot.slane %v200_v8, %v95_v55  ;;  %s609_s30 = sshll.u32 %s908_s4, 4  ;;  %s610_s30 = int_to_ptr.vmem [resolvable:$true] %s609_s30 }
  0x60   :  { %s869_s8 = scalar_lea.vmem %s610_s30, 128  ;;  %p874_p5 = scmp.lt.s32.totalorder %s610_s30, %s610_s30 }
  0x61   :  { %680 = vmatpush3.bf16.msra.mxu0 %v766_v44  ;;  %p870_p4 = scmp.ne.s32.totalorder %s610_s30, %s869_s8  ;;  %p875_p6 = scmp.lt.s32.totalorder %s869_s8, %s869_s8 }
  0x62   :  { %383 = vmatpush1.bf16.msra.mxu1 %v730_v18  ;;  %681 = vmatprep.subr.bf16.mxu0 %v767_v45 }
  0x63   :  { %384 = vmatprep.subr.bf16.mxu1 %v731_v19  ;;  %p876_p7 = por %p875_p6, %p874_p5 }
  0x65   :  { %682 = vmatpush3.bf16.msra.mxu0 %v768_v46  ;;  %p877_p8 = pnand %p876_p7, %p870_p4 }
  0x66   :  { %385 = vmatpush1.bf16.msra.mxu1 %v733_v20  ;;  %683 = vmatprep.subr.bf16.mxu0 %v769_v47 }
  0x67   :  { %386 = vmatprep.subr.bf16.mxu1 %v734_v21 }
  0x69   :  { %684 = vmatpush3.bf16.msra.mxu0 %v770_v48 }
  0x6a   :  { %387 = vmatpush1.bf16.msra.mxu1 %v736_v22  ;;  %685 = vmatprep.subr.bf16.mxu0 %v771_v49  ;;  %v657_v22 = vld [vmem:[%s1030_s6] ss:$0 sm:$0xff] }
  0x6b   :  { %388 = vmatprep.subr.bf16.mxu1 %v737_v23 }
  0x6d   :  { %686 = vmatpush3.bf16.msra.mxu0 %v772_v50 }
  0x6e   :  { %389 = vmatpush1.bf16.msra.mxu1 %v739_v24  ;;  %687 = vmatprep.subr.bf16.mxu0 %v773_v4 }
  0x6f   :  { %390 = vmatprep.subr.bf16.mxu1 %v740_v25 }
  0x71   :  { %688 = vmatpush3.bf16.msra.mxu0 %v774_v5 }
  0x72   :  { %391 = vmatpush1.bf16.msra.mxu1 %v742_v26  ;;  %689 = vmatprep.subr.bf16.mxu0 %v775_v6 }
  0x73   :  { %392 = vmatprep.subr.bf16.mxu1 %v743_v27 }
  0x75   :  { %690 = vmatpush3.bf16.msra.mxu0 %v776_v7 }
  0x76   :  { %393 = vmatpush1.bf16.msra.mxu1 %v745_v28 }
  0x77   :  { %394 = vmatprep.subr.bf16.mxu1 %v746_v29 }
  0x7a   :  { %395 = vmatpush1.bf16.msra.mxu1 %v748_v30 }
  0x7b   :  { %396 = vmatprep.subr.bf16.mxu1 %v749_v31  ;;  %v593_v31 = vand.u32 127, %v89_v51 }
  0x7d   :  { %vm594_vm1 = vcmp.eq.s32.totalorder %v593_v31, 4 }
  0x7e   :  { %397 = vmatpush1.bf16.msra.mxu1 %v751_v32 }
  0x7f   :  { %398 = vmatprep.subr.bf16.mxu1 %v752_v33 }
  0x82   :  { %399 = vmatpush1.bf16.msra.mxu1 %v754_v34 }
  0x83   :  { %400 = vmatprep.subr.bf16.mxu1 %v755_v35 }
  0x86   :  { %401 = vmatpush1.bf16.msra.mxu1 %v757_v36 }
  0x87   :  { %402 = vmatprep.subr.bf16.mxu1 %v758_v37 }
  0x8a   :  { %403 = vmatpush1.bf16.msra.mxu1 %v760_v38 }
 0x126   :  { %v157_v58 = vpop.f32.mrb[0].mxu0 }
 0x127   :  { %v158_v59 = vadd.f32 %v157_v58, %v92_v56  ;;  %v159_v60 = vpop.f32.mrb[1].mxu0 }
 0x128   :  { %v160_v61 = vadd.f32 %v159_v60, %v96_v57  ;;  %v161_v62 = vpop.f32.mrb[2].mxu0 }
 0x129   :  { %v164_v63 = vmax.f32 %v158_v59, 0.0  ;;  %v162_v0 = vpop.f32.mrb[3].mxu0 }
 0x12a   :  { %v165_v1 = vmax.f32 %v160_v61, 0.0 }
 0x12b   :  { %v166_v3 = vpack.c.bf16 %v164_v63, %v164_v63 }
 0x12c   :  { %v167_v2 = vpack.c.bf16 %v165_v1, %v165_v1 }
 0x12e   :  { %404 = vmatprep.mubr.bf16.mxu1 %v167_v2 }
 0x12f   :  { %405 = vmatmul.mubr.bf16.vlgmr.msra.gmra.mrb[0].mxu1 %v166_v3 }
 0x202   :  { %v406_v11 = vpop.f32.mrb[0].mxu1 }
 0x203   :  { %v407_v12 = vadd.f32 %v406_v11, %v205_v9  ;;  %v408_v13 = vpop.f32.mrb[1].mxu1 }
 0x204   :  { %v409_v14 = vadd.f32 %v408_v13, %v209_v10  ;;  %v410_v15 = vpop.f32.mrb[2].mxu1 }
 0x205   :  { %v413_v16 = vmax.f32 %v407_v12, 0.0  ;;  %v411_v17 = vpop.f32.mrb[3].mxu1 }
 0x206   :  { %v414_v18 = vmax.f32 %v409_v14, 0.0 }
 0x207   :  { %v415_v20 = vpack.c.bf16 %v413_v16, %v413_v16 }
 0x208   :  { %v416_v19 = vpack.c.bf16 %v414_v18, %v414_v18 }
 0x20a   :  { %584 = vmatprep.mubr.bf16.mxu0 %v416_v19 }
 0x20b   :  { %585 = vmatmul.mubr.bf16.vlgmr.msra.gmra.mrb[4].mxu0 %v415_v20 }
 0x2de   :  { %v691_v21 = vpop.f32.mrb[4].mxu0 }
 0x2df   :  { %v692_v23 = vpop.f32.mrb[5].mxu0 }
 0x2e0   :  { %v693_v24 = vadd.f32 %v692_v23, %v691_v21  ;;  %v694_v25 = vpop.f32.mrb[6].mxu0 }
 0x2e1   :  { %v695_v26 = vpop.f32.mrb[7].mxu0 }
 0x2e2   :  { %v587_v27 = vadd.f32 %v693_v24, %v657_v22 }
 0x2e4   :  { %v674_v28 = vmul.f32 -1.442695, %v587_v27 }
 0x2e6   :  { %777 = vpow2.f32 %v674_v28 }
 0x2f0   :  { %v778_v29 = vpop.eup %777 }
 0x2f1   :  { %v598_v30 = vadd.f32 1.0, %v778_v29 }
 0x2f3   :  { %779 = vrcp.f32 %v598_v30 }
 0x2fd   :  { %v780_v32 = vpop.eup %779 }
 0x2fe   :  { %v601_v33 = vsel %vm594_vm1, %v780_v32, %v587_v27 }
 0x2ff   :  { %602 = vst [vmem:[#allocation10] sm:$0xff] %v601_v33 }
 0x300   :  { %880 = shalt.err (!%p877_p8)
}
 0x301   :  { %s881_s10 = scalar_lea.hbm %s1031_s7, 128 }
 0x302   :  { %p882_p9 = scmp.ne.s32.totalorder %s1031_s7, %s881_s10  ;;  %p885_p10 = scmp.lt.u32.totalorder %s881_s10, %s1031_s7 }
 0x304   :  { %p887_p11 = pnand %p885_p10, %p882_p9 }
 0x306   :  { %890 = shalt.err (!%p887_p11)
}
 0x307   :  { %612 = dma.vmem_to_hbm [thread:$0]  %s610_s30, 128, %s1031_s7, [#allocation4]  }
 0x308   :  { %897 = dma.done.wait [#allocation4], 128  }
 0x309   :  { %898 = vsyncadd [#allocation4], 4294967168 }
 0x30a   :  { %616 = vsyncpa [#allocation3], 1 }
 0x30b   :  { %617 = vsyncpa [#allocation6], 1 }
 0x30c   :  { %618 = vsyncpa [#allocation9], 1 }
 0x30d   :  { %619 = vsyncpa [#allocation4], 1 }

</bundles_post_ra>
